<compile_context>
chip_gen: v7x
topology: tpu7x:2x2x1
jax: 0.10.0
libtpu: 0.0.40
codegen_flags: <defaults>
</compile_context>

<pallas_src>
import functools

import jax
import jax.numpy as jnp
from jax.experimental import pallas as pl
from jax.experimental.pallas import tpu as pltpu


def _round_up(a, b):
    return (a + b - 1) // b * b


def _var_partial_kernel(x_ref, osum_ref, osq_ref, acc_ref, sq_ref, *,
                        tiles_per_core, tile_rows, total_rows, need_mask):
    """Per-core partial sums / sums-of-squares for a biased variance.

    x_ref   : (tile_rows, d2) VMEM tile of the row-flattened input
    osum_ref: (1, 1, d2) per-lane partial sum for this core index
    osq_ref : (1, 1, d2) per-lane partial sum of squares for this core index
    acc_ref : (tile_rows, d2) f32 VMEM accumulator for sum(x)
    sq_ref  : (tile_rows, d2) f32 VMEM accumulator for sum(x*x)
    """
    c = pl.program_id(0)  # outer split ("parallel" -> megacore on v7x)
    i = pl.program_id(1)  # tile within this core's range ("arbitrary")

    @pl.when(i == 0)
    def _():
        acc_ref[...] = jnp.zeros_like(acc_ref)
        sq_ref[...] = jnp.zeros_like(sq_ref)

    x = x_ref[...]
    if need_mask:
        tile_id = c * tiles_per_core + i
        row_start = tile_id * tile_rows
        row_ids = jax.lax.broadcasted_iota(jnp.int32, x.shape, 0)
        x = jnp.where(row_ids + row_start < total_rows, x, 0.0)

    # Pure-VPU accumulation; cross-lane reduce deferred to the epilogue.
    acc_ref[...] += x
    sq_ref[...] += x * x

    @pl.when(i == tiles_per_core - 1)
    def _():
        osum_ref[0] = jnp.sum(acc_ref[...], axis=0, keepdims=True)
        osq_ref[0] = jnp.sum(sq_ref[...], axis=0, keepdims=True)


def var_biased(x, *, tile_rows=None, target_tile_bytes=2 * 1024 * 1024):
    """Pallas equivalent of torch.ops.aten.var(x, unbiased=False) -> scalar."""
    assert x.ndim == 3 and x.dtype == jnp.float32
    d0, d1, d2 = x.shape
    n_total = d0 * d1 * d2
    rows = d0 * d1

    # Row-flatten: free (row-major merge of leading dims); lets us pick a
    # VMEM-budget-sized row tile independent of the original (d1, d2) split.
    x2 = x.reshape(rows, d2)

    if tile_rows is None:
        tr = (target_tile_bytes // (d2 * 4)) // 8 * 8
        tile_rows = max(8, min(_round_up(rows, 8), tr))
    else:
        tile_rows = max(8, _round_up(tile_rows, 8))

    tiles_total = pl.cdiv(rows, tile_rows)
    # Two-way outer split marked "parallel": on v7x each TensorCore streams
    # half the rows; on single-TC chips the two outer steps just run serially.
    nc = 2 if tiles_total >= 2 else 1
    tpc = pl.cdiv(tiles_total, nc)
    covered_rows = nc * tpc * tile_rows
    need_mask = covered_rows != rows

    if nc * tpc == tiles_total:
        in_index = lambda c, i: (c * tpc + i, 0)
    else:
        # Idle trailing tiles of the last core get clamped to an in-bounds
        # block; their contribution is masked to zero inside the kernel.
        in_index = lambda c, i: (jnp.minimum(c * tpc + i, tiles_total - 1), 0)

    kernel = functools.partial(
        _var_partial_kernel,
        tiles_per_core=tpc,
        tile_rows=tile_rows,
        total_rows=rows,
        need_mask=need_mask,
    )

    out_block = pl.BlockSpec((1, 1, d2), lambda c, i: (c, 0, 0))
    partial_sum, partial_sq = pl.pallas_call(
        kernel,
        out_shape=(
            jax.ShapeDtypeStruct((nc, 1, d2), jnp.float32),
            jax.ShapeDtypeStruct((nc, 1, d2), jnp.float32),
        ),
        grid_spec=pltpu.PrefetchScalarGridSpec(
            num_scalar_prefetch=0,
            grid=(nc, tpc),
            in_specs=[pl.BlockSpec((tile_rows, d2), in_index)],
            out_specs=[out_block, out_block],
            scratch_shapes=[
                pltpu.VMEM((tile_rows, d2), jnp.float32),
                pltpu.VMEM((tile_rows, d2), jnp.float32),
            ],
        ),
        compiler_params=pltpu.CompilerParams(
            dimension_semantics=("parallel", "arbitrary"),
        ),
        cost_estimate=pl.CostEstimate(
            flops=3 * n_total,
            transcendentals=0,
            bytes_accessed=4 * n_total + 8 * nc * d2,
        ),
    )(x2)

    total_sum = jnp.sum(partial_sum)
    total_sq = jnp.sum(partial_sq)
    inv_n = jnp.float32(1.0 / n_total)
    mean = total_sum * inv_n
    # Biased (population) variance: E[x^2] - (E[x])^2.  Vector/tree
    # accumulation above keeps f32 error small for typical inputs.
    # TODO(synk): switch to a shifted/Welford formulation if |mean| >> stddev
    # at very large N becomes a concern.
    return total_sq * inv_n - mean * mean


if __name__ == "__main__":
    key = jax.random.PRNGKey(0)
    # Small 3-D float32 input consistent with ([-1, -1, -1], float32).
    x = jax.random.normal(key, (3, 20, 128), dtype=jnp.float32) + 1.5

    ref = jnp.var(x)  # biased (population) variance over all elements

    # Default (auto) tiling: a single large row tile.
    out = jax.block_until_ready(var_biased(x))
    assert jnp.allclose(out, ref, rtol=1e-5, atol=1e-5), (out, ref)

    # Forced small tile: exercises the multi-tile grid, the 2-way "parallel"
    # core split, and the tail-row masking path.
    out_small = jax.block_until_ready(var_biased(x, tile_rows=8))
    assert jnp.allclose(out_small, ref, rtol=1e-5, atol=1e-5), (out_small, ref)

    print("KERNEL_OK")
</pallas_src>

<mosaic_0001>
module attributes {stable_mosaic.version = 11 : i64} {
  func.func @_var_partial_kernel(%arg0: i32, %arg1: i32, %arg2: memref<64x128xf32, #tpu.memory_space<vmem>>, %arg3: memref<1x1x128xf32, #tpu.memory_space<vmem>>, %arg4: memref<1x1x128xf32, #tpu.memory_space<vmem>>, %arg5: memref<64x128xf32, #tpu.memory_space<vmem>>, %arg6: memref<64x128xf32, #tpu.memory_space<vmem>>) attributes {dimension_semantics = [#tpu.dimension_semantics<parallel>, #tpu.dimension_semantics<arbitrary>], iteration_bounds = array<i64: 1, 1>, scalar_prefetch = 0 : i64, scratch_operands = 2 : i64, tpu.core_type = #tpu.core_type<tc>, window_params = [{transform_indices = @transform_0, window_bounds = array<i64: 64, 128>}, {transform_indices = @transform_1, window_bounds = array<i64: 1, 1, 128>}, {transform_indices = @transform_2, window_bounds = array<i64: 1, 1, 128>}]} {
    %c0_i32 = arith.constant 0 : i32
    %0 = arith.cmpi eq, %arg1, %c0_i32 : i32
    %1 = arith.extui %0 : i1 to i32
    %c0_i32_0 = arith.constant 0 : i32
    %2 = arith.cmpi ne, %1, %c0_i32_0 : i32
    scf.if %2 {
      %cst_12 = arith.constant 0.000000e+00 : f32
      %24 = vector.broadcast %cst_12 : f32 to vector<64x128xf32>
      %c0_13 = arith.constant 0 : index
      %c0_14 = arith.constant 0 : index
      %25 = vector.load %arg5[%c0_13, %c0_14] : memref<64x128xf32, #tpu.memory_space<vmem>>, vector<64x128xf32>
      tpu.vector_store %arg5[%c0_13, %c0_14], %24 {strides = array<i32>} : memref<64x128xf32, #tpu.memory_space<vmem>>, vector<64x128xf32>,
      %cst_15 = arith.constant 0.000000e+00 : f32
      %26 = vector.broadcast %cst_15 : f32 to vector<64x128xf32>
      %c0_16 = arith.constant 0 : index
      %c0_17 = arith.constant 0 : index
      %27 = vector.load %arg6[%c0_16, %c0_17] : memref<64x128xf32, #tpu.memory_space<vmem>>, vector<64x128xf32>
      tpu.vector_store %arg6[%c0_16, %c0_17], %26 {strides = array<i32>} : memref<64x128xf32, #tpu.memory_space<vmem>>, vector<64x128xf32>,
    } else {
    }
    %c0 = arith.constant 0 : index
    %c0_1 = arith.constant 0 : index
    %3 = vector.load %arg2[%c0, %c0_1] : memref<64x128xf32, #tpu.memory_space<vmem>>, vector<64x128xf32>
    %c1_i32 = arith.constant 1 : i32
    %4 = arith.muli %arg0, %c1_i32 : i32
    %5 = arith.addi %4, %arg1 : i32
    %c64_i32 = arith.constant 64 : i32
    %6 = arith.muli %5, %c64_i32 : i32
    %7 = tpu.iota {dimensions = array<i32: 0>} : vector<64x128xi32>
    %8 = vector.broadcast %6 : i32 to vector<64x128xi32>
    %9 = arith.addi %7, %8 : vector<64x128xi32>
    %c60_i32 = arith.constant 60 : i32
    %10 = vector.broadcast %c60_i32 : i32 to vector<64x128xi32>
    %11 = arith.cmpi slt, %9, %10 : vector<64x128xi32>
    %cst = arith.constant 0.000000e+00 : f32
    %12 = vector.broadcast %cst : f32 to vector<64x128xf32>
    %13 = arith.select %11, %3, %12 : vector<64x128xi1>, vector<64x128xf32>
    %c0_2 = arith.constant 0 : index
    %c0_3 = arith.constant 0 : index
    %14 = vector.load %arg5[%c0_2, %c0_3] : memref<64x128xf32, #tpu.memory_space<vmem>>, vector<64x128xf32>
    %15 = arith.addf %14, %13 : vector<64x128xf32>
    %c0_4 = arith.constant 0 : index
    %c0_5 = arith.constant 0 : index
    %16 = vector.load %arg5[%c0_4, %c0_5] : memref<64x128xf32, #tpu.memory_space<vmem>>, vector<64x128xf32>
    tpu.vector_store %arg5[%c0_4, %c0_5], %15 {strides = array<i32>} : memref<64x128xf32, #tpu.memory_space<vmem>>, vector<64x128xf32>,
    %c0_6 = arith.constant 0 : index
    %c0_7 = arith.constant 0 : index
    %17 = vector.load %arg6[%c0_6, %c0_7] : memref<64x128xf32, #tpu.memory_space<vmem>>, vector<64x128xf32>
    %18 = arith.mulf %13, %13 : vector<64x128xf32>
    %19 = arith.addf %17, %18 : vector<64x128xf32>
    %c0_8 = arith.constant 0 : index
    %c0_9 = arith.constant 0 : index
    %20 = vector.load %arg6[%c0_8, %c0_9] : memref<64x128xf32, #tpu.memory_space<vmem>>, vector<64x128xf32>
    tpu.vector_store %arg6[%c0_8, %c0_9], %19 {strides = array<i32>} : memref<64x128xf32, #tpu.memory_space<vmem>>, vector<64x128xf32>,
    %c0_i32_10 = arith.constant 0 : i32
    %21 = arith.cmpi eq, %arg1, %c0_i32_10 : i32
    %22 = arith.extui %21 : i1 to i32
    %c0_i32_11 = arith.constant 0 : i32
    %23 = arith.cmpi ne, %22, %c0_i32_11 : i32
    scf.if %23 {
      %c0_12 = arith.constant 0 : index
      %c0_13 = arith.constant 0 : index
      %24 = vector.load %arg5[%c0_12, %c0_13] : memref<64x128xf32, #tpu.memory_space<vmem>>, vector<64x128xf32>
      %cst_14 = arith.constant dense<0.000000e+00> : vector<128xf32>
      %25 = vector.multi_reduction <add>, %24, %cst_14 [0] : vector<64x128xf32> to vector<128xf32>
      %26 = vector.shape_cast %25 : vector<128xf32> to vector<1x128xf32>
      %c0_15 = arith.constant 0 : index
      %c0_16 = arith.constant 0 : index
      %c0_17 = arith.constant 0 : index
      %27 = vector.load %arg3[%c0_15, %c0_16, %c0_17] : memref<1x1x128xf32, #tpu.memory_space<vmem>>, vector<1x1x128xf32>
      %28 = vector.shape_cast %27 : vector<1x1x128xf32> to vector<1x128xf32>
      %29 = vector.shape_cast %26 : vector<1x128xf32> to vector<1x1x128xf32>
      tpu.vector_store %arg3[%c0_15, %c0_16, %c0_17], %29 {strides = array<i32>} : memref<1x1x128xf32, #tpu.memory_space<vmem>>, vector<1x1x128xf32>,
      %c0_18 = arith.constant 0 : index
      %c0_19 = arith.constant 0 : index
      %30 = vector.load %arg6[%c0_18, %c0_19] : memref<64x128xf32, #tpu.memory_space<vmem>>, vector<64x128xf32>
      %cst_20 = arith.constant dense<0.000000e+00> : vector<128xf32>
      %31 = vector.multi_reduction <add>, %30, %cst_20 [0] : vector<64x128xf32> to vector<128xf32>
      %32 = vector.shape_cast %31 : vector<128xf32> to vector<1x128xf32>
      %c0_21 = arith.constant 0 : index
      %c0_22 = arith.constant 0 : index
      %c0_23 = arith.constant 0 : index
      %33 = vector.load %arg4[%c0_21, %c0_22, %c0_23] : memref<1x1x128xf32, #tpu.memory_space<vmem>>, vector<1x1x128xf32>
      %34 = vector.shape_cast %33 : vector<1x1x128xf32> to vector<1x128xf32>
      %35 = vector.shape_cast %32 : vector<1x128xf32> to vector<1x1x128xf32>
      tpu.vector_store %arg4[%c0_21, %c0_22, %c0_23], %35 {strides = array<i32>} : memref<1x1x128xf32, #tpu.memory_space<vmem>>, vector<1x1x128xf32>,
    } else {
    }
    return
  }
  func.func @transform_0(%arg0: i32, %arg1: i32) -> (i32, i32) {
    %c1_i32 = arith.constant 1 : i32
    %0 = arith.muli %arg0, %c1_i32 : i32
    %1 = arith.addi %0, %arg1 : i32
    %c0_i32 = arith.constant 0 : i32
    %c0_i32_0 = arith.constant 0 : i32
    return %1, %c0_i32 : i32, i32
  }
  func.func @transform_1(%arg0: i32, %arg1: i32) -> (i32, i32, i32) {
    %c0_i32 = arith.constant 0 : i32
    %c0_i32_0 = arith.constant 0 : i32
    %c0_i32_1 = arith.constant 0 : i32
    return %arg0, %c0_i32, %c0_i32_0 : i32, i32, i32
  }
  func.func @transform_2(%arg0: i32, %arg1: i32) -> (i32, i32, i32) {
    %c0_i32 = arith.constant 0 : i32
    %c0_i32_0 = arith.constant 0 : i32
    %c0_i32_1 = arith.constant 0 : i32
    return %arg0, %c0_i32, %c0_i32_0 : i32, i32, i32
  }
}

</mosaic_0001>

<bundles_post_ra>
// kernel: tpu_custom_call.1
= control target key start
LH: loop header
LB: loop body
LE: loop exit
PB: predicated region body
PF: predicated region fallthrough
CT: control target
= control target key end

     0   :  { %8 = vsyncpa [#allocation5], 0  ;;  %s369_s0 = inlined_call_operand.hbm [shape: f32[60,128], index: 0, kind: input, shape index: {}]   ;;  %s370_s1 = inlined_call_operand.hbm [shape: f32[1,1,128], index: 1, kind: output, shape index: {0}]   ;;  %s371_s2 = inlined_call_operand.hbm [shape: f32[1,1,128], index: 2, kind: output, shape index: {1}]  }
   0x1   :  { %9 = vsyncpa [#allocation6], 0 }
   0x2   :  { %10 = vsyncpa [#allocation9], 0  ;;  %s305_s9 = smov [#allocation4]   ;;  %s233_s13 = scalar_lea.hbm %s369_s0, 1024 }
   0x3   :  { %s20_s10 = sshll.u32 %s305_s9, 4  ;;  %p234_p0 = scmp.ne.s32.totalorder %s369_s0, %s233_s13  ;;  %s21_s10 = int_to_ptr.vmem [resolvable:$true] %s20_s10 }
   0x4   :  { %p237_p1 = scmp.lt.u32.totalorder %s233_s13, %s369_s0 }
   0x6   :  { %p239_p2 = pnand %p237_p1, %p234_p0 }
   0x8   :  { %242 = shalt.err (!%p239_p2)
}
   0x9   :  { %s243_s18 = scalar_lea.vmem %s21_s10, 1024  ;;  %p248_p4 = scmp.lt.s32.totalorder %s21_s10, %s21_s10 }
   0xa   :  { %p244_p3 = scmp.ne.s32.totalorder %s21_s10, %s243_s18  ;;  %p249_p5 = scmp.lt.s32.totalorder %s243_s18, %s243_s18 }
   0xc   :  { %p250_p6 = por %p249_p5, %p248_p4 }
   0xe   :  { %p251_p7 = pnand %p250_p6, %p244_p3 }
  0x10   :  { %254 = shalt.err (!%p251_p7)
}
  0x11   :  { %s306_s19 = smov 128   ;;  %s307_s20 = smov 8  }
  0x12   :  { %26 = dma.hbm_to_vmem [thread:$0]  %s369_s0, 1024, %s21_s10, [#allocation5], %s306_s19, %s306_s19, %s307_s20  }
  0x13   :  { %299 = dma.done.wait [#allocation5], 1024  }
  0x14   :  { %300 = vsyncadd [#allocation5], 4294966272  ;;  %v62_v0 = vlaneseq  ;;  %v52_v2 = vld [vmem:[#allocation4] sm:$0xff]  ;;  %v53_v3 = vld [vmem:[#allocation4 + $0x8] sm:$0xff]  ;;  %s308_s0 = smov [#allocation7]   ;;  %s309_s24 = smov [#allocation8]  }
  0x15   :  { %v54_v4 = vld [vmem:[#allocation4 + $0x10] sm:$0xff]  ;;  %v55_v6 = vld [vmem:[#allocation4 + $0x18] sm:$0xff]  ;;  %v163_v7 = vadd.f32 %v53_v3, %v52_v2  ;;  %v128_v8 = vmul.f32 %v52_v2, %v52_v2  ;;  %v129_v9 = vmul.f32 %v53_v3, %v53_v3  ;;  %v56_v11 = vld [vmem:[#allocation4 + $0x20] sm:$0xff]  ;;  %s205_s23 = sshll.u32 %s308_s0, 4  ;;  %s215_s25 = sshll.u32 %s309_s24, 4  ;;  %s206_s23 = int_to_ptr.vmem [resolvable:$true] %s205_s23  ;;  %s337_s25 = int_to_ptr.vmem [resolvable:$true] %s215_s25 }
  0x16   :  { %v63_v1 = vshrl.u32 %v62_v0, 7  ;;  %v130_v10 = vmul.f32 %v54_v4, %v54_v4  ;;  %v131_v13 = vmul.f32 %v55_v6, %v55_v6  ;;  %v57_v15 = vld [vmem:[#allocation4 + $0x28] sm:$0xff]  ;;  %v59_v16 = vld [vmem:[#allocation4 + $0x38] sm:$0xff]  ;;  %v132_v18 = vmul.f32 %v56_v11, %v56_v11  ;;  %v58_v20 = vld [vmem:[#allocation4 + $0x30] sm:$0xff]  ;;  %s255_s26 = scalar_lea.vmem %s206_s23, 16  ;;  %s259_s27 = scalar_lea.vmem %s206_s23, 32 }
  0x17   :  { %v164_v12 = vadd.f32 %v163_v7, %v54_v4  ;;  %v185_v14 = vadd.f32 %v129_v9, %v128_v8  ;;  %v133_v22 = vmul.f32 %v57_v15, %v57_v15  ;;  %v134_v26 = vmul.f32 %v58_v20, %v58_v20  ;;  %p256_p8 = scmp.ne.s32.totalorder %s206_s23, %s255_s26  ;;  %p260_p9 = scmp.lt.s32.totalorder %s206_s23, %s206_s23 }
  0x18   :  { %v70_v5 = vadd.s32 56, %v63_v1  ;;  %p261_p10 = scmp.lt.s32.totalorder %s259_s27, %s255_s26 }
  0x19   :  { %v165_v17 = vadd.f32 %v164_v12, %v55_v6  ;;  %v186_v19 = vadd.f32 %v185_v14, %v130_v10 }
  0x1a   :  { %vm87_vm0 = vcmp.lt.s32.totalorder %v70_v5, 60  ;;  %p262_p11 = por %p261_p10, %p260_p9 }
  0x1b   :  { %v166_v21 = vadd.f32 %v165_v17, %v56_v11  ;;  %v187_v23 = vadd.f32 %v186_v19, %v131_v13  ;;  %v95_v24 = vsel %vm87_vm0, %v59_v16, 0.0 }
  0x1c   :  { %v135_v29 = vmul.f32 %v95_v24, %v95_v24  ;;  %p263_p12 = pnand %p262_p11, %p256_p8 }
  0x1d   :  { %v167_v25 = vadd.f32 %v166_v21, %v57_v15  ;;  %v188_v27 = vadd.f32 %v187_v23, %v132_v18 }
  0x1f   :  { %v168_v28 = vadd.f32 %v167_v25, %v58_v20  ;;  %v189_v30 = vadd.f32 %v188_v27, %v133_v22 }
  0x21   :  { %v169_v31 = vadd.f32 %v168_v28, %v95_v24  ;;  %v190_v32 = vadd.f32 %v189_v30, %v134_v26 }
  0x23   :  { %v170_v33 = vrot.slane %v169_v31, 4  ;;  %v191_v34 = vadd.f32 %v190_v32, %v135_v29 }
  0x25   :  { %v171_v35 = vadd.f32 %v170_v33, %v169_v31  ;;  %v192_v36 = vrot.slane %v191_v34, 4 }
  0x27   :  { %v172_v37 = vrot.slane %v171_v35, 2  ;;  %v193_v38 = vadd.f32 %v192_v36, %v191_v34 }
  0x29   :  { %v173_v39 = vadd.f32 %v172_v37, %v171_v35  ;;  %v194_v40 = vrot.slane %v193_v38, 2 }
  0x2b   :  { %v174_v41 = vrot.slane %v173_v39, 1  ;;  %v195_v42 = vadd.f32 %v194_v40, %v193_v38 }
  0x2d   :  { %v175_v43 = vadd.f32 %v174_v41, %v173_v39  ;;  %v196_v44 = vrot.slane %v195_v42, 1 }
  0x2f   :  { %176 = vst [vmem:[#allocation7] sm:$0x1] %v175_v43  ;;  %v197_v45 = vadd.f32 %v196_v44, %v195_v42 }
  0x30   :  { %266 = shalt.err (!%p263_p12)
}
  0x31   :  { %s267_s30 = scalar_lea.hbm %s370_s1, 16 }
  0x32   :  { %p268_p13 = scmp.ne.s32.totalorder %s370_s1, %s267_s30  ;;  %p271_p0 = scmp.lt.u32.totalorder %s267_s30, %s370_s1 }
  0x34   :  { %p273_p1 = pnand %p271_p0, %p268_p13 }
  0x36   :  { %276 = shalt.err (!%p273_p1)
}
  0x37   :  { %208 = dma.vmem_to_hbm [thread:$0]  %s206_s23, 16, %s370_s1, [#allocation6]   ;;  %198 = vst [vmem:[#allocation8] sm:$0x1] %v197_v45 }
  0x38   :  { %s277_s9 = scalar_lea.vmem %s337_s25, 16  ;;  %s281_s10 = scalar_lea.vmem %s337_s25, 32 }
  0x39   :  { %p278_p2 = scmp.ne.s32.totalorder %s337_s25, %s277_s9  ;;  %p282_p3 = scmp.lt.s32.totalorder %s337_s25, %s337_s25 }
  0x3a   :  { %p283_p4 = scmp.lt.s32.totalorder %s281_s10, %s277_s9 }
  0x3c   :  { %p284_p5 = por %p283_p4, %p282_p3 }
  0x3e   :  { %p285_p6 = pnand %p284_p5, %p278_p2 }
  0x40   :  { %288 = shalt.err (!%p285_p6)
}
  0x41   :  { %s289_s13 = scalar_lea.hbm %s371_s2, 16 }
  0x42   :  { %p290_p7 = scmp.ne.s32.totalorder %s371_s2, %s289_s13  ;;  %p293_p8 = scmp.lt.u32.totalorder %s289_s13, %s371_s2 }
  0x44   :  { %p295_p9 = pnand %p293_p8, %p290_p7 }
  0x46   :  { %298 = shalt.err (!%p295_p9)
}
  0x47   :  { %218 = dma.vmem_to_hbm [thread:$0]  %s337_s25, 16, %s371_s2, [#allocation9]  }
  0x48   :  { %301 = dma.done.wait [#allocation6], 16  }
  0x49   :  { %302 = vsyncadd [#allocation6], 4294967280 }
  0x4a   :  { %303 = dma.done.wait [#allocation9], 16  }
  0x4b   :  { %304 = vsyncadd [#allocation9], 4294967280 }
  0x4c   :  { %225 = vsyncpa [#allocation5], 1 }
  0x4d   :  { %226 = vsyncpa [#allocation6], 1 }
  0x4e   :  { %227 = vsyncpa [#allocation9], 1 }

</bundles_post_ra>
